<compile_context>
chip_gen: v6e
topology: v6e:2x2x1
jax: 0.10.0
libtpu: 0.0.40
codegen_flags: <defaults>
</compile_context>

<pallas_src>
import math
import jax
import jax.numpy as jnp
from jax import lax
from jax.experimental import pallas as pl
from jax.experimental.pallas import tpu as pltpu


# ----------------------------------------------------------------------------
# Kernels
# ----------------------------------------------------------------------------
def _make_grouped_kernel(cin_g, K, T_TILE, HALO_W):
    """One MXU contraction per (batch, group, time-tile)."""

    def kernel(xc_ref, xh_ref, w_ref, b_ref, o_ref):
        # xc_ref : (cin_g, T_TILE)        current time tile of this group's input
        # xh_ref : (cin_g, HALO_W)        block immediately left of the tile
        # w_ref  : (cout_g, K*cin_g)      folded (lane-dense) weights, rows k*cin_g+ic
        # b_ref  : (cout_g, 1)            f32 bias
        # o_ref  : (cout_g, T_TILE)
        t = pl.program_id(2)

        cur = xc_ref[...]                                   # (cin_g, T_TILE)
        halo = xh_ref[:, HALO_W - (K - 1):]                 # (cin_g, K-1)
        # Causal left boundary: first time tile sees zeros instead of a halo.
        halo = jnp.where(t > 0, halo, jnp.zeros_like(halo))

        # Build the im2col slab: row (k*cin_g + ic), column t' holds
        # x[ic, t0 + t' + k - (K-1)].
        pieces = []
        for k in range(K):
            s = K - 1 - k
            if s == 0:
                pieces.append(cur)
            else:
                pieces.append(
                    jnp.concatenate([halo[:, k:], cur[:, :T_TILE - s]], axis=1))
        stacked = jnp.concatenate(pieces, axis=0)           # (K*cin_g, T_TILE)

        acc = jnp.dot(w_ref[...], stacked,
                      preferred_element_type=jnp.float32)   # (cout_g, T_TILE)
        acc = acc + b_ref[...]
        o_ref[...] = acc.astype(o_ref.dtype)

    return kernel


def _make_depthwise_kernel(K, T_TILE, HALO_W):
    """groups == C_in == C_out: pure VPU streaming multiply-add (no MXU)."""

    def kernel(xc_ref, xh_ref, w_ref, b_ref, o_ref):
        # xc_ref : (C, T_TILE), xh_ref : (C, HALO_W)
        # w_ref  : (C, K), b_ref : (C, 1), o_ref : (C, T_TILE)
        t = pl.program_id(1)

        cur = xc_ref[...].astype(jnp.float32)
        halo = xh_ref[:, HALO_W - (K - 1):].astype(jnp.float32)
        halo = jnp.where(t > 0, halo, jnp.zeros_like(halo))
        w = w_ref[...].astype(jnp.float32)                  # (C, K)

        # Tap K-1 is aligned with the current tile; init with bias (no extra pass).
        acc = cur * w[:, K - 1:K] + b_ref[...]
        for k in range(K - 1):
            s = K - 1 - k
            shifted = jnp.concatenate([halo[:, k:], cur[:, :T_TILE - s]], axis=1)
            acc = acc + shifted * w[:, k:k + 1]
        o_ref[...] = acc.astype(o_ref.dtype)

    return kernel


# ----------------------------------------------------------------------------
# Wrapper
# ----------------------------------------------------------------------------
def _pick_t_tile(T, t_tile):
    if t_tile is not None:
        if t_tile >= T or T % t_tile != 0 or t_tile % 128 != 0:
            return T
        return t_tile
    if T % 128 != 0 or T <= 1024:
        return T
    for cand in (1024, 512, 256, 128):
        if T % cand == 0:
            return cand
    return T


def causal_conv1d(x, weight, bias, kernel_size, groups, *,
                  t_tile=None, compute_dtype=None):
    """x: (B, C_in, T); weight: (C_out, C_in//groups, K); bias: (C_out,)."""
    B, C_in, T = x.shape
    C_out, w_cin_g, K = weight.shape
    assert K == kernel_size and K >= 2, "module assumes kernel_size >= 2"
    assert C_in % groups == 0 and C_out % groups == 0
    cin_g = C_in // groups
    cout_g = C_out // groups
    assert w_cin_g == cin_g
    assert T >= K - 1
    out_dtype = x.dtype

    T_TILE = _pick_t_tile(T, t_tile)
    NT = T // T_TILE
    HALO_W = 128 if NT > 1 else T                 # halo block width (>= K-1)
    hbpt = (T_TILE // 128) if NT > 1 else 0       # halo blocks per time tile
    assert HALO_W >= K - 1

    if compute_dtype is not None:
        x = x.astype(compute_dtype)
        weight = weight.astype(compute_dtype)
    bias_f32 = bias.astype(jnp.float32)

    cparams = pltpu.CompilerParams(
        dimension_semantics=None,                 # set per-path below
        vmem_limit_bytes=32 * 1024 * 1024)

    # ---------------- depthwise path (groups == C_in == C_out) ----------------
    if cin_g == 1 and cout_g == 1:
        w2 = weight.reshape(C_out, K)
        b2 = bias_f32.reshape(C_out, 1)
        if NT > 1:
            halo_map = lambda b, t: (b, 0, jnp.maximum(t * hbpt - 1, 0))
        else:
            halo_map = lambda b, t: (b, 0, 0)

        return pl.pallas_call(
            _make_depthwise_kernel(K, T_TILE, HALO_W),
            out_shape=jax.ShapeDtypeStruct((B, C_out, T), out_dtype),
            grid_spec=pltpu.PrefetchScalarGridSpec(
                num_scalar_prefetch=0,
                grid=(B, NT),
                in_specs=[
                    pl.BlockSpec((pl.Squeezed(), C_in, T_TILE),
                                 lambda b, t: (b, 0, t)),
                    pl.BlockSpec((pl.Squeezed(), C_in, HALO_W), halo_map),
                    pl.BlockSpec((C_out, K), lambda b, t: (0, 0)),
                    pl.BlockSpec((C_out, 1), lambda b, t: (0, 0)),
                ],
                out_specs=pl.BlockSpec((pl.Squeezed(), C_out, T_TILE),
                                       lambda b, t: (b, 0, t)),
            ),
            compiler_params=pltpu.CompilerParams(
                dimension_semantics=("parallel", "parallel"),
                vmem_limit_bytes=32 * 1024 * 1024),
        )(x, x, w2, b2)

    # ---------------- grouped / dense MXU path ----------------
    if groups > 1:
        # Sublane-aligned group blocks keep loads/stores unmasked.
        assert cin_g % 8 == 0 and cout_g % 8 == 0, (
            "for groups > 1 this kernel requires per-group channel counts that "
            "are multiples of 8")
        # TODO(synk): pad per-group channels up to a multiple of 8 instead of asserting.

    # Fold the K taps into one lane-dense contraction matrix per group:
    # w_folded[g, oc_local, k*cin_g + ic] = weight[g*cout_g + oc_local, ic, k]
    w_folded = (weight.reshape(groups, cout_g, cin_g, K)
                      .transpose(0, 1, 3, 2)
                      .reshape(groups, cout_g, K * cin_g))
    b3 = bias_f32.reshape(groups, cout_g, 1)

    if NT > 1:
        halo_map = lambda b, g, t: (b, g, jnp.maximum(t * hbpt - 1, 0))
    else:
        halo_map = lambda b, g, t: (b, g, 0)

    return pl.pallas_call(
        _make_grouped_kernel(cin_g, K, T_TILE, HALO_W),
        out_shape=jax.ShapeDtypeStruct((B, C_out, T), out_dtype),
        grid_spec=pltpu.PrefetchScalarGridSpec(
            num_scalar_prefetch=0,
            grid=(B, groups, NT),
            in_specs=[
                # current time tile of this group's input channels
                pl.BlockSpec((pl.Squeezed(), cin_g, T_TILE),
                             lambda b, g, t: (b, g, t)),
                # halo block (the 128 columns immediately left of the tile)
                pl.BlockSpec((pl.Squeezed(), cin_g, HALO_W), halo_map),
                # folded weights / bias for this group (resident, lane-dense)
                pl.BlockSpec((pl.Squeezed(), cout_g, K * cin_g),
                             lambda b, g, t: (g, 0, 0)),
                pl.BlockSpec((pl.Squeezed(), cout_g, 1),
                             lambda b, g, t: (g, 0, 0)),
            ],
            out_specs=pl.BlockSpec((pl.Squeezed(), cout_g, T_TILE),
                                   lambda b, g, t: (b, g, t)),
        ),
        compiler_params=pltpu.CompilerParams(
            dimension_semantics=("parallel", "parallel", "parallel"),
            vmem_limit_bytes=32 * 1024 * 1024),
    )(x, x, w_folded, b3)


# ----------------------------------------------------------------------------
# Init + pure-JAX reference
# ----------------------------------------------------------------------------
def init_params(key, in_channels, out_channels, kernel_size, groups):
    fan_in = (in_channels // groups) * kernel_size
    bound = 1.0 / math.sqrt(fan_in)
    kw, kb = jax.random.split(key)
    weight = jax.random.uniform(
        kw, (out_channels, in_channels // groups, kernel_size),
        minval=-bound, maxval=bound, dtype=jnp.float32)
    bias = jax.random.uniform(
        kb, (out_channels,), minval=-bound, maxval=bound, dtype=jnp.float32)
    return weight, bias


def reference_causal_conv1d(x, weight, bias, kernel_size, groups):
    K = kernel_size
    y = lax.conv_general_dilated(
        x, weight, window_strides=(1,), padding=[(K - 1, 0)],
        dimension_numbers=("NCH", "OIH", "NCH"),
        feature_group_count=groups)
    return y + bias.reshape(1, -1, 1)


# ----------------------------------------------------------------------------
if __name__ == "__main__":
    key = jax.random.PRNGKey(0)
    kx, kp, kd = jax.random.split(key, 3)

    # Grouped conv, time-tiled with a left halo (exercises the MXU path).
    B, C_in, C_out, K, G, T = 2, 16, 16, 3, 2, 256
    x = jax.random.normal(kx, (B, C_in, T), dtype=jnp.float32)
    weight, bias = init_params(kp, C_in, C_out, K, G)

    y = jax.block_until_ready(causal_conv1d(x, weight, bias, K, G, t_tile=128))
    y_ref = reference_causal_conv1d(x, weight, bias, K, G)
    assert y.shape == (B, C_out, T)
    assert jnp.allclose(y, y_ref, atol=1e-5, rtol=1e-5), "grouped f32 mismatch"

    # bf16 compute path (f32 accumulation) — looser tolerance.
    y_bf16 = jax.block_until_ready(
        causal_conv1d(x, weight, bias, K, G, t_tile=128,
                      compute_dtype=jnp.bfloat16))
    assert jnp.allclose(y_bf16, y_ref, atol=5e-2, rtol=5e-2), "bf16 mismatch"

    # Small / non-128 T falls back to a single full-time tile.
    T2 = 24
    x2 = jax.random.normal(kd, (B, C_in, T2), dtype=jnp.float32)
    y2 = jax.block_until_ready(causal_conv1d(x2, weight, bias, K, G))
    y2_ref = reference_causal_conv1d(x2, weight, bias, K, G)
    assert jnp.allclose(y2, y2_ref, atol=1e-5, rtol=1e-5), "single-tile mismatch"

    # Depthwise conv (groups == C_in == C_out) — VPU path.
    C, Kd, Td = 16, 4, 256
    wd, bd = init_params(jax.random.PRNGKey(1), C, C, Kd, C)
    xd = jax.random.normal(jax.random.PRNGKey(2), (B, C, Td), dtype=jnp.float32)
    yd = jax.block_until_ready(causal_conv1d(xd, wd, bd, Kd, C, t_tile=128))
    yd_ref = reference_causal_conv1d(xd, wd, bd, Kd, C)
    assert jnp.allclose(yd, yd_ref, atol=1e-5, rtol=1e-5), "depthwise mismatch"

    print("KERNEL_OK")
</pallas_src>

<mosaic_0001>
module attributes {stable_mosaic.version = 11 : i64} {
  func.func @kernel(%arg0: i32, %arg1: i32, %arg2: i32, %arg3: memref<1x8x128xf32, #tpu.memory_space<vmem>>, %arg4: memref<1x8x128xf32, #tpu.memory_space<vmem>>, %arg5: memref<1x8x24xf32, #tpu.memory_space<vmem>>, %arg6: memref<1x8x1xf32, #tpu.memory_space<vmem>>, %arg7: memref<1x8x128xf32, #tpu.memory_space<vmem>>) attributes {dimension_semantics = [#tpu.dimension_semantics<parallel>, #tpu.dimension_semantics<parallel>, #tpu.dimension_semantics<parallel>], iteration_bounds = array<i64: 2, 2, 2>, scalar_prefetch = 0 : i64, scratch_operands = 0 : i64, tpu.core_type = #tpu.core_type<tc>, window_params = [{transform_indices = @transform_0, window_bounds = array<i64: 1, 8, 128>}, {transform_indices = @transform_1, window_bounds = array<i64: 1, 8, 128>}, {transform_indices = @transform_2, window_bounds = array<i64: 1, 8, 24>}, {transform_indices = @transform_3, window_bounds = array<i64: 1, 8, 1>}, {transform_indices = @transform_4, window_bounds = array<i64: 1, 8, 128>}]} {
    %c0 = arith.constant 0 : index
    %c0_0 = arith.constant 0 : index
    %c0_1 = arith.constant 0 : index
    %0 = vector.load %arg3[%c0, %c0_0, %c0_1] : memref<1x8x128xf32, #tpu.memory_space<vmem>>, vector<1x8x128xf32>
    %1 = vector.shape_cast %0 : vector<1x8x128xf32> to vector<8x128xf32>
    %c0_2 = arith.constant 0 : index
    %c0_3 = arith.constant 0 : index
    %c126 = arith.constant 126 : index
    %2 = vector.load %arg4[%c0_2, %c0_3, %c126] : memref<1x8x128xf32, #tpu.memory_space<vmem>>, vector<1x8x2xf32>
    %3 = vector.shape_cast %2 : vector<1x8x2xf32> to vector<8x2xf32>
    %c0_i32 = arith.constant 0 : i32
    %4 = arith.cmpi sgt, %arg2, %c0_i32 : i32
    %cst = arith.constant 0.000000e+00 : f32
    %5 = vector.broadcast %cst : f32 to vector<8x2xf32>
    %6 = arith.select %4, %3, %5 : vector<8x2xf32>
    %7 = vector.extract_strided_slice %1 {offsets = [0, 0], sizes = [8, 126], strides = [1, 1]} : vector<8x128xf32> to vector<8x126xf32>
    %8 = tpu.concatenate %6, %7 in 1 : vector<8x2xf32>, vector<8x126xf32> -> vector<8x128xf32>
    %9 = vector.extract_strided_slice %6 {offsets = [0, 1], sizes = [8, 1], strides = [1, 1]} : vector<8x2xf32> to vector<8x1xf32>
    %10 = vector.extract_strided_slice %1 {offsets = [0, 0], sizes = [8, 127], strides = [1, 1]} : vector<8x128xf32> to vector<8x127xf32>
    %11 = tpu.concatenate %9, %10 in 1 : vector<8x1xf32>, vector<8x127xf32> -> vector<8x128xf32>
    %12 = tpu.concatenate %8, %11, %1 in 0 : vector<8x128xf32>, vector<8x128xf32>, vector<8x128xf32> -> vector<24x128xf32>
    %c0_4 = arith.constant 0 : index
    %c0_5 = arith.constant 0 : index
    %c0_6 = arith.constant 0 : index
    %13 = vector.load %arg5[%c0_4, %c0_5, %c0_6] : memref<1x8x24xf32, #tpu.memory_space<vmem>>, vector<1x8x24xf32>
    %14 = vector.shape_cast %13 : vector<1x8x24xf32> to vector<8x24xf32>
    %cst_7 = arith.constant dense<0.000000e+00> : vector<8x128xf32>
    %15 = tpu.matmul %14, %12, %cst_7 {dimension_numbers = #tpu.dot_dimension_numbers<[1], [0], [0], [1], [0, 0, 1, 1], [], []>} : vector<8x24xf32>, vector<24x128xf32>, vector<8x128xf32> -> vector<8x128xf32>
    %c0_8 = arith.constant 0 : index
    %c0_9 = arith.constant 0 : index
    %c0_10 = arith.constant 0 : index
    %16 = vector.load %arg6[%c0_8, %c0_9, %c0_10] : memref<1x8x1xf32, #tpu.memory_space<vmem>>, vector<1x8x1xf32>
    %17 = vector.shape_cast %16 : vector<1x8x1xf32> to vector<8x1xf32>
    %18 = vector.broadcast %17 : vector<8x1xf32> to vector<8x128xf32>
    %19 = arith.addf %15, %18 : vector<8x128xf32>
    %c0_11 = arith.constant 0 : index
    %c0_12 = arith.constant 0 : index
    %c0_13 = arith.constant 0 : index
    %20 = vector.load %arg7[%c0_11, %c0_12, %c0_13] : memref<1x8x128xf32, #tpu.memory_space<vmem>>, vector<1x8x128xf32>
    %21 = vector.shape_cast %20 : vector<1x8x128xf32> to vector<8x128xf32>
    %22 = vector.shape_cast %19 : vector<8x128xf32> to vector<1x8x128xf32>
    tpu.vector_store %arg7[%c0_11, %c0_12, %c0_13], %22 {strides = array<i32>} : memref<1x8x128xf32, #tpu.memory_space<vmem>>, vector<1x8x128xf32>,
    return
  }
  func.func @transform_0(%arg0: i32, %arg1: i32, %arg2: i32) -> (i32, i32, i32) {
    %c0_i32 = arith.constant 0 : i32
    return %arg0, %arg1, %arg2 : i32, i32, i32
  }
  func.func @transform_1(%arg0: i32, %arg1: i32, %arg2: i32) -> (i32, i32, i32) {
    %c1_i32 = arith.constant 1 : i32
    %0 = arith.muli %arg2, %c1_i32 : i32
    %c1_i32_0 = arith.constant 1 : i32
    %1 = arith.subi %0, %c1_i32_0 : i32
    %c0_i32 = arith.constant 0 : i32
    %2 = arith.maxsi %1, %c0_i32 : i32
    %c0_i32_1 = arith.constant 0 : i32
    return %arg0, %arg1, %2 : i32, i32, i32
  }
  func.func @transform_2(%arg0: i32, %arg1: i32, %arg2: i32) -> (i32, i32, i32) {
    %c0_i32 = arith.constant 0 : i32
    %c0_i32_0 = arith.constant 0 : i32
    %c0_i32_1 = arith.constant 0 : i32
    return %arg1, %c0_i32, %c0_i32_0 : i32, i32, i32
  }
  func.func @transform_3(%arg0: i32, %arg1: i32, %arg2: i32) -> (i32, i32, i32) {
    %c0_i32 = arith.constant 0 : i32
    %c0_i32_0 = arith.constant 0 : i32
    %c0_i32_1 = arith.constant 0 : i32
    return %arg1, %c0_i32, %c0_i32_0 : i32, i32, i32
  }
  func.func @transform_4(%arg0: i32, %arg1: i32, %arg2: i32) -> (i32, i32, i32) {
    %c0_i32 = arith.constant 0 : i32
    return %arg0, %arg1, %arg2 : i32, i32, i32
  }
}

</mosaic_0001>

<bundles_post_ra>
// kernel: tpu_custom_call.1
= control target key start
LH: loop header
LB: loop body
LE: loop exit
PB: predicated region body
PF: predicated region fallthrough
CT: control target
= control target key end

     0   :  { %s1329_s0 = inlined_call_operand.hbm [shape: f32[2,16,256], index: 0, kind: input, shape index: {}]   ;;  %s1330_s1 = inlined_call_operand.hbm [shape: f32[2,16,256], index: 1, kind: input, shape index: {}]   ;;  %s1331_s2 = inlined_call_operand.vmem [shape: f32[2,8,24], index: 2, kind: input, shape index: {}]   ;;  %s1332_s3 = inlined_call_operand.vmem [shape: f32[2,8,1], index: 3, kind: input, shape index: {}]   ;;  %s1333_s4 = inlined_call_operand.hbm [shape: f32[2,16,256], index: 4, kind: output, shape index: {}]  }
   0x1   :  { %1349 = sst [smem:[#allocation17_spill]] %s1329_s0 }
   0x2   :  { %1350 = sst [smem:[#allocation18_spill]] %s1331_s2 }
   0x3   :  { %1351 = sst [smem:[#allocation19_spill]] %s1332_s3 }
   0x4   :  { %1352 = sst [smem:[#allocation20_spill]] %s1333_s4 }
   0x5   :  { %9 = vsyncpa [#allocation3], 0 }
   0x6   :  { %11 = vsyncpa [#allocation3 + $0x1], 0 }
   0x7   :  { %12 = vsyncpa [#allocation6], 0 }
   0x8   :  { %14 = vsyncpa [#allocation6 + $0x1], 0 }
   0x9   :  { %15 = vsyncpa [#allocation4], 0 }
   0xa   :  { %17 = vsyncpa [#allocation4 + $0x1], 0  ;;  %s1010_s15 = smov 0   ;;  %s1012_s16 = smov 0  }
   0xb   :  { %s1014_s17 = smov 0   ;;  %s1016_s18 = smov 0  }
   0xc   :  { %s1018_s19 = smov 0   ;;  %s1020_s20 = smov 0  }
   0xd   :  { %s1022_s21 = smov 0   ;;  %s1024_s22 = smov 0  }
   0xe   :  { %s1026_s23 = smov 0   ;;  %s1028_s24 = smov 0  }
   0xf   :  { %s1030_s25 = smov 0   ;;  %s1032_s26 = smov 0  }
  0x10   :  { %s1034_s27 = smov 0  }
  0x11 LB: > { %1353 = sst [smem:[#allocation11_spill]] %s939_s18  ;;  %s606_s28 = sadd.s32 4294967295, %s975_s27   ;;  %s975_s27 = sphi %s1034_s27, %s23_s27   ;;  %s971_s26 = sphi %s1032_s26, %s1404_s26   ;;  %s967_s25 = sphi %s1030_s25, %s1403_s25   ;;  %s963_s24 = sphi %s1028_s24, %s1402_s24   ;;  %s959_s23 = sphi %s1026_s23, %s1401_s23   ;;  %s955_s22 = sphi %s1024_s22, %s1400_s22   ;;  %s951_s21 = sphi %s1022_s21, %s1399_s21   ;;  %s947_s20 = sphi %s1020_s20, %s1398_s20   ;;  %s943_s19 = sphi %s1018_s19, %s1397_s19   ;;  %s939_s18 = sphi %s1016_s18, %s1396_s18   ;;  %s935_s17 = sphi %s1014_s17, %s1395_s17   ;;  %s931_s16 = sphi %s1012_s16, %s1394_s16   ;;  %s927_s15 = sphi %s1010_s15, %s1393_s15  }
  0x12   : > { %1354 = sst [smem:[#allocation12_spill]] %s955_s22  ;;  %s607_s29 = sadd.s32 4294967294, %s975_s27  }
  0x13   : > { %1355 = sst [smem:[#allocation13_spill]] %s959_s23  ;;  %s1334_s30 = sadd.s32 1, %s963_s24 }
  0x14   : > { %s38_s5 = sadd.s32 1, %s967_s25  ;;  %p1081_p0 = scmp.ge.s32.totalorder %s1334_s30, 2 }
  0x15   : > { %s42_s7 = sadd.s32 1, %s971_s26  ;;  %p60_p1 = scmp.ne.s32.totalorder %s947_s20, %s943_s19 }
  0x16   : > { %s1406_s5 = smov (!%p1081_p0, %s38_s5), %s967_s25  ;;  %p1342_p2 = scmp.eq.s32.totalorder %s975_s27, 0 }
  0x17   : > { %p66_p3 = scmp.ne.s32.totalorder %s943_s19, %s939_s18  ;;  %p1343_p4 = scmp.ge.s32.totalorder %s1406_s5, 2 }
  0x18   : > { %p1098_p5 = scmp.eq.s32.totalorder %s606_s28, 0  ;;  %p1104_p6 = por %p1342_p2, %p60_p1 }
  0x19   : > { %p182_p7 = scmp.eq.s32.totalorder %s606_s28, 7  ;;  %s1408_s7 = smov (!%p1343_p4, %s42_s7), %s971_s26 }
  0x1a   : > { %p1115_p8 = por %p1098_p5, %p66_p3  ;;  %p188_p11 = scmp.eq.s32.totalorder %s607_s29, 7 }
  0x1b   : > { %p1119_p9 = por %p182_p7, %p60_p1  ;;  %p1345_p12 = scmp.lt.s32.totalorder %s975_s27, 8 }
  0x1c   : > { %s1359_s11 = scalar_select %p1115_p8, 1, 0 }
  0x1d   : > { %s1360_s12 = scalar_select %p1119_p9, 1, 0 }
  0x1e   : > { %p1125_p13 = por %p188_p11, %p66_p3  ;;  %s208_s14 = sand.u32 1, %s947_s20  }
  0x1f   : > { %1361 = sst [smem:[#allocation14_spill]] %s1360_s12  ;;  %s612_s28 = sshll.u32 %s208_s14, 3 }
  0x20   : > { %s1362_s13 = scalar_select %p1125_p13, 1, 0 }
  0x21   : > { %s1341_s8 = sshll.u32 %s967_s25, 1  ;;  %s614_s18 = sshll.u32 %s971_s26, 2 }
  0x22   : > { %1363 = sst [smem:[#allocation15_spill]] %s1362_s13  ;;  %s217_s30 = sadd.s32 %s963_s24, %s1341_s8 }
  0x23   : > { %s219_s4 = sadd.s32 %s614_s18, %s217_s30  ;;  %s212_s12 = scalar_lea.vmem [#allocation2], %s612_s28 }
  0x24   : > { %s223_s2 = sshll.u32 %s212_s12, 4  ;;  %s615_s23 = sshll.u32 %s219_s4, 7  ;;  %s224_s2 = int_to_ptr.vmem [resolvable:$true] %s223_s2 }
  0x25   : > { %s1364_s0 = sld [smem:[#allocation17_spill]]  ;;  %p1144_p1 = pnand %p1345_p12, %p1104_p6 }
  0x26   : > { %p621_p3 = scmp.ge.s32.totalorder %s975_s27, 1  ;;  %p267_p7 = scmp.lt.s32.totalorder %s975_s27, 9 }
  0x27   : > { %s209_s8 = scalar_lea.sflag [#allocation3], %s208_s14  ;;  %p781_p11 = pneg %p1144_p1 }
  0x28   : > { %s792_s30 = scalar_lea.vmem %s224_s2, 128  ;;  %s977_s4 = smov [#allocation2]  }
  0x29   : > { %p793_p2 = scmp.ne.s32.totalorder %s224_s2, %s792_s30  ;;  %s797_s12 = sshll.u32 %s977_s4, 4  ;;  %s798_s12 = int_to_ptr.vmem [resolvable:$false] %s797_s12 }
  0x2a   : > { %s799_s3 = scalar_lea.vmem %s798_s12, 256  ;;  %p800_p13 = scmp.lt.s32.totalorder %s224_s2, %s798_s12 }
  0x2b   : > { %s221_s22 = scalar_lea.hbm %s1364_s0, %s615_s23  ;;  %p795_p10 = pnand %p793_p2, %p781_p11 }
  0x2c   : > { %p801_p9 = scmp.lt.s32.totalorder %s799_s3, %s792_s30 }
  0x2d   : > { %p796_p4 = pneg %p795_p10 }
  0x2e   : > { %p802_p6 = por %p801_p9, %p800_p13 }
  0x30   : > { %p803_p12 = pnand %p802_p6, %p796_p4 }
  0x32   : > { %806 = shalt.err (!%p803_p12)
}
  0x33   : > { %656 = dma.hbm_to_vmem [thread:$0]  (!%p1144_p1), %s221_s22, 128, %s224_s2, %s209_s8  }
  0x34   : > { %p1158_p2 = pnand %p621_p3, %p267_p7  ;;  %s1367_s10 = sadd.s32 1, %s963_s24 }
  0x35   : > { %s1410_s10 = smov (%p1081_p0, %s1367_s10), 0  ;;  %p1368_p4 = scmp.ge.s32.totalorder %s1406_s5, 2 }
  0x36   : > { %s1366_s23 = scalar_select %p1158_p2, 1, 0 }
  0x37   : > { %s1412_s5 = smov (%p1368_p4, %s1406_s5), 0  ;;  %p1369_p9 = scmp.ge.s32.totalorder %s1408_s7, 2 }
  0x38   : > { %s47_s2 = ssub.s32 %s967_s25, %s1412_s5  ;;  %s49_s22 = ssub.s32 %s963_s24, %s1410_s10 }
  0x39   : > { %s1414_s7 = smov (%p1369_p9, %s1408_s7), 0  ;;  %s1371_s14 = sadd.s32 1, %s947_s20 }
  0x3a   : > { %1370 = sst [smem:[#allocation16_spill]] %s1414_s7  ;;  %s46_s8 = ssub.s32 %s971_s26, %s1414_s7 }
  0x3b   : > { %s48_s6 = sor.u32 %s47_s2, %s46_s8  ;;  %s89_s29 = sadd.s32 1, %s935_s17 }
  0x3c   : > { %s50_s13 = sor.u32 %s49_s22, %s48_s6  ;;  %p102_p10 = scmp.ne.s32.totalorder %s931_s16, %s927_s15 }
  0x3d   : > { %p51_p0 = scmp.eq.s32.totalorder %s50_s13, 0  ;;  %p96_p12 = scmp.ne.s32.totalorder %s935_s17, %s931_s16 }
  0x3e   : > { %p87_p13 = scmp.eq.s32.totalorder %s48_s6, 0  ;;  %p1196_p1 = por %p102_p10, %p1098_p5 }
  0x3f   : > { %s1187_s28 = scalar_select %p51_p0, %s947_s20, %s1371_s14  }
  0x40   : > { %s1372_s30 = scalar_select %p1196_p1, 1, 0 }
  0x41   : > { %s230_s4 = sand.u32 1, %s935_s17   ;;  %p1373_p3 = scmp.eq.s32.totalorder %s975_s27, 0 }
  0x42   : > { %s1202_s12 = scalar_select %p87_p13, %s935_s17, %s89_s29  }
  0x43   : > { %p98_p7 = por %p96_p12, %p1373_p3  ;;  %s616_s3 = sshll.u32 %s230_s4, 3 }
  0x44   : > { %s1374_s2 = sshll.u32 %s967_s25, 1  ;;  %s234_s13 = scalar_lea.vmem [#allocation5], %s616_s3 }
  0x45   : > { %s244_s22 = sadd.s32 %s614_s18, %s1374_s2  ;;  %s248_s14 = sshll.u32 %s234_s13, 4  ;;  %s249_s14 = int_to_ptr.vmem [resolvable:$true] %s248_s14 }
  0x46   : > { %s620_s8 = sshll.u32 %s244_s22, 7  ;;  %p1375_p5 = scmp.lt.s32.totalorder %s975_s27, 8 }
  0x47   : > { %s246_s9 = scalar_lea.hbm %s1330_s1, %s620_s8  ;;  %s231_s29 = scalar_lea.sflag [#allocation6], %s230_s4 }
  0x48   : > { %p1215_p11 = pnand %p1375_p5, %p98_p7  ;;  %s807_s7 = scalar_lea.hbm %s246_s9, 128 }
  0x49   : > { %p808_p6 = scmp.ne.s32.totalorder %s246_s9, %s807_s7  ;;  %p813_p10 = scmp.lt.s32.totalorder %s246_s9, %s1330_s1 }
  0x4a   : > { %p809_p4 = pneg %p1215_p11 }
  0x4c   : > { %p810_p9 = pnand %p809_p4, %p808_p6 }
  0x4e   : > { %p811_p0 = pneg %p810_p9 }
  0x50   : > { %p816_p12 = pnand %p813_p10, %p811_p0 }
  0x52   : > { %819 = shalt.err (!%p816_p12)
}
  0x53   : > { %s820_s0 = scalar_lea.vmem %s249_s14, 128  ;;  %s978_s2 = smov [#allocation5]  }
  0x54   : > { %p821_p13 = scmp.ne.s32.totalorder %s249_s14, %s820_s0  ;;  %s825_s22 = sshll.u32 %s978_s2, 4  ;;  %s826_s22 = int_to_ptr.vmem [resolvable:$false] %s825_s22 }
  0x55   : > { %s827_s4 = scalar_lea.vmem %s826_s22, 256  ;;  %p828_p5 = scmp.lt.s32.totalorder %s249_s14, %s826_s22 }
  0x56   : > { %p823_p3 = pnand %p821_p13, %p809_p4  ;;  %p829_p1 = scmp.lt.s32.totalorder %s827_s4, %s820_s0 }
  0x58   : > { %p824_p7 = pneg %p823_p3  ;;  %p830_p8 = por %p829_p1, %p828_p5 }
  0x5a   : > { %p831_p2 = pnand %p830_p8, %p824_p7 }
  0x5c   : > { %834 = shalt.err (!%p831_p2)
}
  0x5d   : > { %659 = dma.hbm_to_vmem [thread:$0]  (!%p1215_p11), %s246_s9, 128, %s249_s14, %s231_s29  }
  0x5e   : > { %p1377_p6 = scmp.ne.s32.totalorder %s1366_s23, 0 }
  0x5f   : > { %s1229_s7 = sand.u32 (!%p1377_p6), 1, %s943_s19   ;;  %p1378_p1 = scmp.ne.s32.totalorder (!%p1377_p6), %s1359_s11, 0 }
  0x60   : > { %271 = sbr.rel (%p1377_p6) target bundleno = 442 (0x1ba), region = 36  ;;  %s622_s8 = sshll.u32 (!%p1377_p6), %s1229_s7, 3 }
  0x61   : > { %s274_s13 = scalar_lea.sflag (!%p1377_p6), [#allocation3], %s1229_s7  ;;  %s277_s15 = scalar_lea.vmem (!%p1377_p6), [#allocation2], %s622_s8 }
  0x65   : > { %914 = dma.done.wait (%p1378_p1), %s274_s13, 128  }
  0x66   : > { %916 = vsyncadd (%p1378_p1), %s274_s13, 4294967168  ;;  %s282_s23 = sand.u32 1, %s931_s16   ;;  %p1379_p8 = scmp.ne.s32.totalorder %s1372_s30, 0 }
  0x67   : > { %s623_s14 = sshll.u32 %s282_s23, 3  ;;  %s283_s9 = scalar_lea.sflag [#allocation6], %s282_s23 }
  0x68   : > { %s286_s6 = scalar_lea.vmem [#allocation5], %s623_s14 }
  0x69   : > { %918 = dma.done.wait (%p1379_p8), %s283_s9, 128  }
  0x6a   : > { %920 = vsyncadd (%p1379_p8), %s283_s9, 4294967168  ;;  %s1380_s29 = sld [smem:[#allocation12_spill]]  ;;  %p337_p2 = scmp.gt.s32.totalorder %s951_s21, 0  ;;  %v979_v0 = vmov 0.0   ;;  %vm980_vm0 = vmmov 0   ;;  %v981_v1 = vmov 0  }
  0x6b   : > { %638 = vmatprep.subr.mxu0 %v979_v0  ;;  %644 = vmatprep.mubr.msk.f32.mxu0 %vm980_vm0, %v979_v0  ;;  %v335_v2 = vld [vmem:[%s277_s15] sm:$0xff]  ;;  %s982_s3 = smov 2   ;;  %s983_s30 = smov 1   ;;  %vm358_vm1 = vcmask 7168   ;;  %vm350_vm2 = vcmask 15360   ;;  %vm367_vm3 = vcmask 195584  }
  0x6c   : > { %775 = vset.pattern.permute.xlu0 %v981_v1  ;;  %s777_s18 = scalar_select %p337_p2, 255, 0  ;;  %639 = vmatpush3.msra.mxu0 %v335_v2 }
  0x6d   : > { %640 = vmatprep.subr.mxu0 %v979_v0  ;;  %s1381_s4 = sld [smem:[#allocation19_spill]]  ;;  %s323_s22 = scalar_lea.vmem [#allocation7], %s622_s8 }
  0x6e   : > { %v778_v3 = vld [vmem:[%s286_s6] sm:%s777_s18]  ;;  %s1382_s15 = sld [smem:[#allocation13_spill]] }
  0x6f   : > { %343 = vrot.lane.b32.xlu1 %v778_v3, %s982_s3  ;;  %352 = vrot.lane.b32.xlu0 %v778_v3, %s983_s30  ;;  %s1383_s9 = sld [smem:[#allocation18_spill]] }
  0x70   : > { %p327_p11 = scmp.lt.s32.totalorder %s1380_s29, 1  ;;  %s1385_s14 = sld [smem:[#allocation20_spill]] }
  0x72   : > { %s328_s11 = scalar_select %p327_p11, %s1380_s29, 1 }
  0x73   : > { %347 = vrot.lane.b32.xlu1 %v335_v2, %s982_s3  ;;  %355 = vrot.lane.b32.xlu0 %v335_v2, %s983_s30  ;;  %s1384_s3 = sld [smem:[#allocation14_spill]] }
  0x74   : > { %s625_s0 = sshll.u32 %s328_s11, 3  ;;  %s629_s11 = sshll.u32 %s1380_s29, 1 }
  0x75   : > { %s334_s13 = scalar_lea.vmem %s1381_s4, %s625_s0  ;;  %s330_s6 = scalar_lea.vmem %s1383_s9, %s625_s0 }
  0x76   : > { %v361_v4 = vld [vmem:[%s334_s13] sm:$0xff]  ;;  %s454_s18 = sadd.s32 %s951_s21, %s629_s11  ;;  %s630_s30 = sshll.u32 %s1382_s15, 2 }
  0x77   : > { %364 = vperm.xlu0 %775, %v361_v4   ;;  %v360_v10 = vld [vmem:[%s330_s6] sm:$0xff]  ;;  %s456_s2 = sadd.s32 %s630_s30, %s454_s18  ;;  %s460_s4 = sshll.u32 %s323_s22, 4  ;;  %s461_s4 = int_to_ptr.vmem [resolvable:$true] %s460_s4 }
  0x78   : > { %s631_s0 = sshll.u32 %s456_s2, 7  ;;  %s443_s29 = scalar_lea.sflag [#allocation4], %s1229_s7 }
  0x79   : > { %s1261_s9 = scalar_lea.hbm %s1385_s14, %s631_s0  ;;  %s835_s21 = scalar_lea.vmem %s461_s4, 128 }
  0x7a   : > { %p836_p4 = scmp.ne.s32.totalorder %s461_s4, %s835_s21  ;;  %p1386_p9 = scmp.ne.s32.totalorder %s1384_s3, 0 }
  0x7b   : > { %s984_s15 = smov [#allocation7]  }
  0x7c   : > { %p837_p0 = pnand %p836_p4, %p1386_p9  ;;  %s839_s6 = sshll.u32 %s984_s15, 4  ;;  %s840_s6 = int_to_ptr.vmem [resolvable:$false] %s839_s6 }
  0x7d   : > { %s841_s8 = scalar_lea.vmem %s840_s6, 256  ;;  %p842_p12 = scmp.lt.s32.totalorder %s461_s4, %s840_s6 }
  0x7e   : > { %p838_p10 = pneg %p837_p0  ;;  %p843_p13 = scmp.lt.s32.totalorder %s841_s8, %s835_s21 }
  0x80   : > { %p844_p3 = por %p843_p13, %p842_p12 }
  0x82   : > { %p845_p7 = pnand %p844_p3, %p838_p10 }
  0xe1   : > { %v344_v5 = vpop.permute.xlu1 %343  ;;  %v353_v6 = vpop.permute.xlu0 %352 }
  0xe5   : > { %v348_v7 = vpop.permute.xlu1 %347  ;;  %v356_v8 = vpop.permute.xlu0 %355 }
  0xe6   : > { %v359_v9 = vsel %vm358_vm1, %v353_v6, %v356_v8  ;;  %v351_v11 = vsel %vm350_vm2, %v344_v5, %v348_v7 }
  0xe7   : > { %641 = vmatpush3.msra.mxu0 %v359_v9 }
  0xe8   : > { %642 = vmatprep.subr.mxu0 %v979_v0 }
  0xe9   : > { %643 = vmatpush3.msra.mxu0 %v351_v11 }
  0xea   : > { %645 = vmatmul.mubr.msk.f32.vlgmr.msra.gmra.mxu0 %vm367_vm3, %v360_v10 }
  0xf2   : > { %v365_v12 = vpop.permute.xlu0 %364 }
 0x1aa   : > { %v437_v13 = vpop.f32.mrf.mxu0 }
 0x1ab   : > { %v438_v14 = vadd.f32 %v437_v13, %v365_v12 }
 0x1ac   : > { %v646_v15 = vpop.f32.mrf.mxu0 }
 0x1ad   : > { %441 = vst [vmem:[%s323_s22] sm:$0xff] %v438_v14 }
 0x1ae   : > { %848 = shalt.err (!%p845_p7)
}
 0x1af   : > { %s849_s11 = scalar_lea.hbm %s1261_s9, 128  ;;  %s853_s30 = scalar_lea.hbm %s1385_s14, 1024 }
 0x1b0   : > { %p850_p5 = scmp.ne.s32.totalorder %s1261_s9, %s849_s11  ;;  %p854_p8 = scmp.lt.s32.totalorder %s1261_s9, %s1385_s14 }
 0x1b1   : > { %p855_p2 = scmp.lt.s32.totalorder %s853_s30, %s849_s11 }
 0x1b2   : > { %p851_p6 = pnand %p850_p5, %p1386_p9 }
 0x1b3   : > { %p856_p11 = por %p855_p2, %p854_p8 }
 0x1b4   : > { %p852_p1 = pneg %p851_p6 }
 0x1b6   : > { %p857_p4 = pnand %p856_p11, %p852_p1 }
 0x1b8   : > { %860 = shalt.err (!%p857_p4)
}
 0x1b9   : > { %651 = dma.vmem_to_hbm [thread:$0]  (%p1386_p9), %s461_s4, 128, %s1261_s9, %s443_s29  }
 0x1ba PF: > { %s1387_s22 = sld [smem:[#allocation11_spill]]  ;;  %p665_p0 = scmp.ge.s32.totalorder %s975_s27, 2 }
 0x1bb   : > { %s1388_s13 = sld [smem:[#allocation15_spill]] }
 0x1c0   : > { %s472_s23 = sand.u32 1, %s1387_s22  }
 0x1c1   : > { %p1389_p10 = scmp.ne.s32.totalorder %s1388_s13, 0  ;;  %s473_s21 = scalar_lea.sflag [#allocation4], %s472_s23 }
 0x1c3   : > { %p661_p12 = pnand %p665_p0, %p1389_p10 }
 0x1c5   : > { %p662_p13 = pneg %p661_p12 }
 0x1c7   : > { %922 = dma.done.wait (%p662_p13), %s473_s21, 128  }
 0x1c8   : > { %924 = vsyncadd (%p662_p13), %s473_s21, 4294967168  ;;  %s23_s27 = sadd.s32 1, %s975_s27   ;;  %s1391_s3 = sld [smem:[#allocation16_spill]] }
 0x1c9   : > { %p1285_p3 = scmp.ge.s32.totalorder %s23_s27, 10   ;;  %s1393_s15 = smov %s931_s16 }
 0x1ca   : > { %s1394_s16 = smov %s935_s17  ;;  %s1395_s17 = smov %s1202_s12 }
 0x1cb   : > { %s1396_s18 = smov %s943_s19  ;;  %s1397_s19 = smov %s947_s20 }
 0x1cc   : > { %s1398_s20 = smov %s1187_s28  ;;  %s1399_s21 = smov %s963_s24 }
 0x1cd   : > { %s1400_s22 = smov %s967_s25  ;;  %s1401_s23 = smov %s971_s26 }
 0x1ce   : > { %s1402_s24 = smov %s1410_s10  ;;  %s1403_s25 = smov %s1412_s5 }
 0x1cf   : > { %s1404_s26 = smov %s1391_s3  ;;  %22 = sbr.rel (!%p1285_p3) target bundleno = 17 (0x11), region = 100 }
 0x1d4   :  { %478 = vsyncpa [#allocation3], 1 }
 0x1d5   :  { %480 = vsyncpa [#allocation3 + $0x1], 1 }
 0x1d6   :  { %481 = vsyncpa [#allocation6], 1 }
 0x1d7   :  { %483 = vsyncpa [#allocation6 + $0x1], 1 }
 0x1d8   :  { %484 = vsyncpa [#allocation4], 1 }
 0x1d9   :  { %486 = vsyncpa [#allocation4 + $0x1], 1 }

</bundles_post_ra>
